<compile_context>
chip_gen: v7x
topology: tpu7x:2x2x1
jax: 0.10.0
libtpu: 0.0.40
codegen_flags: <defaults>
</compile_context>

<pallas_src>
import functools
import math

import numpy as np
import jax
import jax.numpy as jnp
from jax.experimental import pallas as pl
from jax.experimental.pallas import tpu as pltpu


# ---------------------------------------------------------------------------
# Fused GAT layer kernel
# ---------------------------------------------------------------------------
def _gat_kernel(src_ref, trg_ref,                                    # SMEM (scalar prefetch)
                x_ref, wp_ref, wskip_ref, asrc_ref, atrg_ref, wa_ref,
                ep_ref, bias_ref,                                    # VMEM inputs
                o_ref,                                               # VMEM output
                proj_ref, ssrc_ref, strg_ref, se_ref, den_ref, agg_ref,  # VMEM scratch
                *, H, Fout, E, concat, apply_elu, tile_skip):
    """Fused GAT layer (eval mode).

    Gathers are dynamic row reads from VMEM scratch driven by edge indices in
    SMEM; scatter-adds accumulate into VMEM scratch with a sequential per-edge
    loop (TPU has no vectorized scatter primitive).
    """
    x = x_ref[...]                                                           # (N, Fin)

    # --- node-level projections (MXU); proj & skip fused into this kernel ---
    proj = jnp.dot(x, wp_ref[...], preferred_element_type=jnp.float32)       # (N, HF)
    proj_ref[...] = proj
    ssrc_ref[...] = jnp.dot(proj, asrc_ref[...],
                            preferred_element_type=jnp.float32)              # (N, H)
    strg_ref[...] = jnp.dot(proj, atrg_ref[...],
                            preferred_element_type=jnp.float32)              # (N, H)
    if tile_skip:
        # Fout == Fin: skip connection adds the raw input to every head.
        skip = jnp.concatenate([x] * H, axis=1)                              # (N, HF)
    else:
        skip = jnp.dot(x, wskip_ref[...], preferred_element_type=jnp.float32)
    agg_ref[...] = skip                  # aggregation accumulator starts at the skip
    den_ref[...] = jnp.zeros_like(den_ref)

    # --- per-edge raw scores: gather node scores (dynamic row reads) --------
    @pl.loop(0, E)
    def _(i):
        s = src_ref[i]
        t = trg_ref[i]
        se_ref[pl.ds(i, 1), :] = (ssrc_ref[pl.ds(s, 1), :] +
                                  strg_ref[pl.ds(t, 1), :])

    # --- trans-prob score (exact per-head fold), LeakyReLU, stabilized exp --
    s_all = se_ref[...] + ep_ref[...] * wa_ref[...]                          # (E, H)
    s_all = jnp.where(s_all > 0.0, s_all, 0.2 * s_all)                       # LeakyReLU(0.2)
    s_all = s_all - jnp.max(s_all)                                           # global max (as in torch code)
    se_ref[...] = jnp.exp(s_all)                                             # reuse scratch: exp scores

    # --- neighborhood-softmax denominator: scatter-add over target nodes ----
    @pl.loop(0, E)
    def _(i):
        t = trg_ref[i]
        den_ref[pl.ds(t, 1), :] += se_ref[pl.ds(i, 1), :]

    # one vectorized EUP reciprocal over nodes, hoisted out of the edge loop
    den_ref[...] = pl.reciprocal(den_ref[...] + 1e-16, approx=True)

    # --- attention-weighted aggregation: gather src row, scatter to target --
    @pl.loop(0, E)
    def _(i):
        s = src_ref[i]
        t = trg_ref[i]
        attn = se_ref[pl.ds(i, 1), :] * den_ref[pl.ds(t, 1), :]              # (1, H)
        # expand per-head attention along the feature axis on the VPU
        a_full = jnp.concatenate(
            [jnp.broadcast_to(attn[:, h:h + 1], (1, Fout)) for h in range(H)],
            axis=1)                                                          # (1, HF)
        agg_ref[pl.ds(t, 1), :] += proj_ref[pl.ds(s, 1), :] * a_full

    # --- concat / head-mean, bias, activation --------------------------------
    agg = agg_ref[...]                                                       # (N, HF)
    if concat:
        out = agg                                                            # no identity matmul
    else:
        out = agg[:, 0:Fout]
        for h in range(1, H):                                                # head mean on the VPU
            out = out + agg[:, h * Fout:(h + 1) * Fout]
        out = out * (1.0 / H)
    out = out + bias_ref[...]
    if apply_elu:
        out = jnp.where(out > 0.0, out, jnp.exp(jnp.minimum(out, 0.0)) - 1.0)  # ELU (clamped exp)
    o_ref[...] = out


# ---------------------------------------------------------------------------
# Token-embedding row gather + positional encoding
# ---------------------------------------------------------------------------
def _embed_pe_kernel(ids_ref, emb_ref, pe_ref, o_ref, *, TB):
    """Row gather from the node-embedding table (dynamic VMEM reads driven by
    SMEM ids) fused with the positional-encoding add."""
    base = pl.program_id(0) * TB

    @pl.loop(0, TB)
    def _(r):
        tok = ids_ref[base + r]
        o_ref[pl.ds(r, 1), :] = emb_ref[pl.ds(tok, 1), :] + pe_ref[pl.ds(r, 1), :]


def embed_pe_pallas(x_ids, node_emb, pe):
    M, d_model = pe.shape
    N = node_emb.shape[0]
    TB = 8 if M % 8 == 0 else M          # keep the sublane dim 8-aligned
    nb = M // TB
    # TODO(synk): for very large vocabularies node_emb will not fit a single
    #             VMEM block; gather rows from HBM with pltpu.make_async_copy.
    grid_spec = pltpu.PrefetchScalarGridSpec(
        num_scalar_prefetch=1,
        grid=(nb,),
        in_specs=[pl.BlockSpec((N, d_model), lambda b, *_: (0, 0)),
                  pl.BlockSpec((TB, d_model), lambda b, *_: (b, 0))],
        out_specs=pl.BlockSpec((TB, d_model), lambda b, *_: (b, 0)))
    return pl.pallas_call(
        functools.partial(_embed_pe_kernel, TB=TB),
        out_shape=jax.ShapeDtypeStruct((M, d_model), jnp.float32),
        grid_spec=grid_spec,
        compiler_params=pltpu.CompilerParams(
            dimension_semantics=("parallel",),   # independent blocks -> both TCs on v7x
            vmem_limit_bytes=32 * 1024 * 1024),
    )(x_ids, node_emb, pe)


# ---------------------------------------------------------------------------
# Parameter construction (deterministic, Xavier-uniform style)
# ---------------------------------------------------------------------------
def _xavier(key, shape, fan_in, fan_out):
    b = math.sqrt(6.0 / (fan_in + fan_out))
    return jax.random.uniform(key, shape, jnp.float32, minval=-b, maxval=b)


def init_gat_layer(key, Fin, Fout, H, concat):
    HF = H * Fout
    ks = jax.random.split(key, 6)
    W_proj = _xavier(ks[0], (HF, Fin), Fin, HF)     # nn.Linear(Fin, HF, bias=False).weight
    W_trans = _xavier(ks[1], (HF, 1), 1, HF)        # nn.Linear(1,  HF, bias=False).weight
    a_src = _xavier(ks[2], (H, Fout), H * Fout, Fout)
    a_trg = _xavier(ks[3], (H, Fout), H * Fout, Fout)
    a_trans = _xavier(ks[4], (H, Fout), H * Fout, Fout)
    W_skip = _xavier(ks[5], (HF, Fin), Fin, HF)
    bias = jnp.zeros((HF if concat else Fout,), jnp.float32)
    return dict(W_proj_T=W_proj.T, W_trans_T=W_trans.T,
                a_src=a_src, a_trg=a_trg, a_trans=a_trans,
                W_skip_T=W_skip.T, bias=bias)


def sinusoidal_pe(max_len, d_model):
    # TODO(synk): PositionalEncoding class body not provided in the source;
    # standard sinusoidal PE (sin on even dims, cos on odd dims) is assumed.
    pos = np.arange(max_len, dtype=np.float32)[:, None]
    div = np.exp(np.arange(0, d_model, 2, dtype=np.float32)
                 * (-math.log(10000.0) / d_model))
    pe = np.zeros((max_len, d_model), np.float32)
    pe[:, 0::2] = np.sin(pos * div)
    pe[:, 1::2] = np.cos(pos * div)
    return jnp.asarray(pe)


def init_bert_embedding_params(key, d_model, node_fea_dim,
                               gat_heads_per_layer, gat_features_per_layer,
                               avg_last=True, max_len=512):
    feats = [node_fea_dim] + list(gat_features_per_layer)
    heads = [1] + list(gat_heads_per_layer)
    assert feats[-1] == d_model
    n_layers = len(heads) - 1
    keys = jax.random.split(key, n_layers)
    layers, cfgs = [], []
    for i in range(n_layers):
        Fin = feats[i] * heads[i]
        Fout = feats[i + 1]
        H = heads[i + 1]
        concat = True if i < n_layers - 1 else (not avg_last)
        apply_elu = i < n_layers - 1            # ELU for all but last layer
        layers.append(init_gat_layer(keys[i], Fin, Fout, H, concat))
        cfgs.append(dict(H=H, Fout=Fout, concat=concat, apply_elu=apply_elu))
    return dict(gat_layers=layers, layer_cfgs=cfgs,
                pe_table=sinusoidal_pe(max_len, d_model), d_model=d_model)


# ---------------------------------------------------------------------------
# Parameter-only preprocessing (glue, jit-safe)
# ---------------------------------------------------------------------------
def _build_score_mat(a):
    """(H, Fout) scoring params -> (H*Fout, H) block diagonal so that
    proj @ A == (proj.view(N, H, Fout) * a).sum(-1)."""
    H, Fout = a.shape
    eye = jnp.eye(H, dtype=a.dtype)
    return (a[:, :, None] * eye[:, None, :]).reshape(H * Fout, H)


# ---------------------------------------------------------------------------
# Forward pass (Pallas)
# ---------------------------------------------------------------------------
def gat_layer_pallas(in_feats, edge_prob, src_idx, trg_idx, p, *,
                     H, Fout, concat, apply_elu):
    N, Fin = in_feats.shape
    E = int(src_idx.shape[0])
    HF = H * Fout
    Dout = HF if concat else Fout
    tile_skip = (Fout == Fin)     # torch: out_nodes_features.shape[-1] == in.shape[-1]

    A_src = _build_score_mat(p['a_src'])                       # (HF, H)
    A_trg = _build_score_mat(p['a_trg'])                       # (HF, H)
    # scores_trans = ((edge_prob @ W_trans_T).view(E,H,F) * a_trans).sum(-1)
    #              = edge_prob * <per-head W_trans row, a_trans>   (exact fold)
    wa = (p['W_trans_T'].reshape(H, Fout) * p['a_trans']).sum(-1).reshape(1, H)
    bias2d = p['bias'].reshape(1, Dout)

    def _fs(shape):
        return pl.BlockSpec(shape, lambda i, *_: (0,) * len(shape))

    kernel = functools.partial(_gat_kernel, H=H, Fout=Fout, E=E, concat=concat,
                               apply_elu=apply_elu, tile_skip=tile_skip)
    f32 = jnp.float32
    grid_spec = pltpu.PrefetchScalarGridSpec(
        num_scalar_prefetch=2,                    # src_idx, trg_idx -> SMEM
        grid=(1,),
        in_specs=[_fs((N, Fin)), _fs((Fin, HF)), _fs((Fin, HF)),
                  _fs((HF, H)), _fs((HF, H)), _fs((1, H)),
                  _fs((E, 1)), _fs((1, Dout))],
        out_specs=pl.BlockSpec((N, Dout), lambda i, *_: (0, 0)),
        scratch_shapes=[pltpu.VMEM((N, HF), f32),   # proj
                        pltpu.VMEM((N, H), f32),    # per-node source scores
                        pltpu.VMEM((N, H), f32),    # per-node target scores
                        pltpu.VMEM((E, H), f32),    # per-edge scores / exp scores
                        pltpu.VMEM((N, H), f32),    # softmax denom / its reciprocal
                        pltpu.VMEM((N, HF), f32)])  # aggregation accumulator (starts at skip)
    return pl.pallas_call(
        kernel,
        out_shape=jax.ShapeDtypeStruct((N, Dout), jnp.float32),
        grid_spec=grid_spec,
        compiler_params=pltpu.CompilerParams(
            dimension_semantics=("arbitrary",),
            vmem_limit_bytes=32 * 1024 * 1024),
    )(src_idx, trg_idx, in_feats, p['W_proj_T'], p['W_skip_T'],
      A_src, A_trg, wa, edge_prob, bias2d)


def bert_embedding_forward(params, graph_dict, sequence, position_ids=None):
    node_features = graph_dict['node_features']
    edge_index = graph_dict['edge_index']
    edge_prob = graph_dict['loc_trans_prob']
    d_model = params['d_model']

    src_idx = edge_index[0].astype(jnp.int32)                       # (E,)
    trg_idx = edge_index[1].astype(jnp.int32)                       # (E,)

    h = node_features
    for p, cfg in zip(params['gat_layers'], params['layer_cfgs']):
        h = gat_layer_pallas(h, edge_prob, src_idx, trg_idx, p, **cfg)
    node_emb = h                                                    # (N, d_model)

    B, T, _ = sequence.shape
    x_ids = sequence[:, :, 1].astype(jnp.int32).reshape(-1)         # (B*T,)
    if position_ids is None:
        pos = jnp.tile(jnp.arange(T), (B,))
    else:
        pos = position_ids.reshape(-1)
    pe = params['pe_table'][pos]                                    # (B*T, d_model)

    out = embed_pe_pallas(x_ids, node_emb, pe)                      # (B*T, d_model)
    # final nn.Dropout(p=0.1) is identity in eval mode
    return out.reshape(B, T, d_model)


# ---------------------------------------------------------------------------
# Pure-JAX reference (PyTorch-style gather / scatter_add formulation)
# ---------------------------------------------------------------------------
def gat_layer_ref(in_feats, edge_index, edge_prob, p, *, H, Fout, concat, apply_elu):
    N, Fin = in_feats.shape
    proj = (in_feats @ p['W_proj_T']).reshape(N, H, Fout)
    trans = (edge_prob @ p['W_trans_T']).reshape(-1, H, Fout)
    s_src = (proj * p['a_src'][None]).sum(-1)
    s_trg = (proj * p['a_trg'][None]).sum(-1)
    s_tp = (trans * p['a_trans'][None]).sum(-1)
    src, trg = edge_index[0], edge_index[1]
    s = s_src[src] + s_trg[trg] + s_tp
    s = jnp.where(s > 0, s, 0.2 * s)
    s = s - jnp.max(s)
    e = jnp.exp(s)
    denom = jnp.zeros((N, H), jnp.float32).at[trg].add(e)
    attn = e / (denom[trg] + 1e-16)
    weighted = proj[src] * attn[..., None]
    out3 = jnp.zeros((N, H, Fout), jnp.float32).at[trg].add(weighted)
    if Fout == Fin:
        out3 = out3 + in_feats[:, None, :]
    else:
        out3 = out3 + (in_feats @ p['W_skip_T']).reshape(N, H, Fout)
    out = out3.reshape(N, H * Fout) if concat else out3.mean(axis=1)
    out = out + p['bias']
    if apply_elu:
        out = jnp.where(out > 0, out, jnp.exp(jnp.minimum(out, 0.0)) - 1.0)
    return out


def bert_embedding_ref(params, graph_dict, sequence):
    h = graph_dict['node_features']
    for p, cfg in zip(params['gat_layers'], params['layer_cfgs']):
        h = gat_layer_ref(h, graph_dict['edge_index'],
                          graph_dict['loc_trans_prob'], p, **cfg)
    B, T, _ = sequence.shape
    d_model = params['d_model']
    x_ids = sequence[:, :, 1].astype(jnp.int32).reshape(-1)
    emb = h[x_ids]
    pos = jnp.tile(jnp.arange(T), (B,))
    return (emb + params['pe_table'][pos]).reshape(B, T, d_model)


# ---------------------------------------------------------------------------
if __name__ == "__main__":
    key = jax.random.PRNGKey(0)
    k_nf, k_src, k_trg, k_ep, k_seq, k_ids, k_params = jax.random.split(key, 7)

    # Config (BERTEmbedding with add_gat=True, add_pe=True, no day/week embeddings)
    d_model = 32
    node_fea_dim = 10
    gat_heads_per_layer = [2, 2]
    gat_features_per_layer = [16, 32]   # last == d_model (avg_last=True)
    N_nodes = 16                        # vocab_size
    B, T, F_seq = 2, 8, 9

    node_features = jax.random.normal(k_nf, (N_nodes, node_fea_dim), jnp.float32)
    rand_src = jax.random.randint(k_src, (24,), 0, N_nodes)
    rand_trg = jax.random.randint(k_trg, (24,), 0, N_nodes)
    self_loops = jnp.arange(N_nodes)
    edge_index = jnp.stack([jnp.concatenate([rand_src, self_loops]),
                            jnp.concatenate([rand_trg, self_loops])]).astype(jnp.int32)
    E = edge_index.shape[1]
    loc_trans_prob = jax.random.uniform(k_ep, (E, 1), jnp.float32)

    sequence = jax.random.normal(k_seq, (B, T, F_seq), jnp.float32)
    road_ids = jax.random.randint(k_ids, (B, T), 0, N_nodes).astype(jnp.float32)
    sequence = sequence.at[:, :, 1].set(road_ids)   # road id feature at index 1

    graph_dict = dict(node_features=node_features, edge_index=edge_index,
                      loc_trans_prob=loc_trans_prob)

    params = init_bert_embedding_params(
        k_params, d_model, node_fea_dim,
        gat_heads_per_layer, gat_features_per_layer, avg_last=True, max_len=512)

    out = bert_embedding_forward(params, graph_dict, sequence)
    out = jax.block_until_ready(out)

    ref = bert_embedding_ref(params, graph_dict, sequence)
    # tolerance slack covers the approximate EUP reciprocal in the softmax;
    # everything else is f32 and matches to ~1e-5.
    np.testing.assert_allclose(np.asarray(out), np.asarray(ref),
                               rtol=5e-3, atol=5e-3)
    assert out.shape == (B, T, d_model)
    print("KERNEL_OK")
</pallas_src>

<mosaic_0001>
module attributes {stable_mosaic.version = 11 : i64} {
  func.func @_gat_kernel(%arg0: i32, %arg1: memref<40xi32, #tpu.memory_space<smem>>, %arg2: memref<40xi32, #tpu.memory_space<smem>>, %arg3: memref<16x10xf32, #tpu.memory_space<vmem>>, %arg4: memref<10x32xf32, #tpu.memory_space<vmem>>, %arg5: memref<10x32xf32, #tpu.memory_space<vmem>>, %arg6: memref<32x2xf32, #tpu.memory_space<vmem>>, %arg7: memref<32x2xf32, #tpu.memory_space<vmem>>, %arg8: memref<1x2xf32, #tpu.memory_space<vmem>>, %arg9: memref<40x1xf32, #tpu.memory_space<vmem>>, %arg10: memref<1x32xf32, #tpu.memory_space<vmem>>, %arg11: memref<16x32xf32, #tpu.memory_space<vmem>>, %arg12: memref<16x32xf32, #tpu.memory_space<vmem>>, %arg13: memref<16x2xf32, #tpu.memory_space<vmem>>, %arg14: memref<16x2xf32, #tpu.memory_space<vmem>>, %arg15: memref<40x2xf32, #tpu.memory_space<vmem>>, %arg16: memref<16x2xf32, #tpu.memory_space<vmem>>, %arg17: memref<16x32xf32, #tpu.memory_space<vmem>>) attributes {dimension_semantics = [#tpu.dimension_semantics<arbitrary>], iteration_bounds = array<i64: 1>, scalar_prefetch = 2 : i64, scratch_operands = 6 : i64, tpu.core_type = #tpu.core_type<tc>, window_params = [{pipeline_mode = #tpu.pipeline_mode<synchronous>, transform_indices = @transform_0, window_bounds = array<i64: 16, 10>}, {pipeline_mode = #tpu.pipeline_mode<synchronous>, transform_indices = @transform_1, window_bounds = array<i64: 10, 32>}, {pipeline_mode = #tpu.pipeline_mode<synchronous>, transform_indices = @transform_2, window_bounds = array<i64: 10, 32>}, {pipeline_mode = #tpu.pipeline_mode<synchronous>, transform_indices = @transform_3, window_bounds = array<i64: 32, 2>}, {pipeline_mode = #tpu.pipeline_mode<synchronous>, transform_indices = @transform_4, window_bounds = array<i64: 32, 2>}, {pipeline_mode = #tpu.pipeline_mode<synchronous>, transform_indices = @transform_5, window_bounds = array<i64: 1, 2>}, {pipeline_mode = #tpu.pipeline_mode<synchronous>, transform_indices = @transform_6, window_bounds = array<i64: 40, 1>}, {pipeline_mode = #tpu.pipeline_mode<synchronous>, transform_indices = @transform_7, window_bounds = array<i64: 1, 32>}, {pipeline_mode = #tpu.pipeline_mode<synchronous>, transform_indices = @transform_8, window_bounds = array<i64: 16, 32>}]} {
    %c0 = arith.constant 0 : index
    %c0_0 = arith.constant 0 : index
    %0 = vector.load %arg3[%c0, %c0_0] : memref<16x10xf32, #tpu.memory_space<vmem>>, vector<16x10xf32>
    %c0_1 = arith.constant 0 : index
    %c0_2 = arith.constant 0 : index
    %1 = vector.load %arg4[%c0_1, %c0_2] : memref<10x32xf32, #tpu.memory_space<vmem>>, vector<10x32xf32>
    %cst = arith.constant dense<0.000000e+00> : vector<16x32xf32>
    %2 = tpu.matmul %0, %1, %cst {dimension_numbers = #tpu.dot_dimension_numbers<[1], [0], [0], [1], [0, 0, 1, 1], [], []>} : vector<16x10xf32>, vector<10x32xf32>, vector<16x32xf32> -> vector<16x32xf32>
    %c0_3 = arith.constant 0 : index
    %c0_4 = arith.constant 0 : index
    %3 = vector.load %arg12[%c0_3, %c0_4] : memref<16x32xf32, #tpu.memory_space<vmem>>, vector<16x32xf32>
    tpu.vector_store %arg12[%c0_3, %c0_4], %2 {strides = array<i32>} : memref<16x32xf32, #tpu.memory_space<vmem>>, vector<16x32xf32>,
    %c0_5 = arith.constant 0 : index
    %c0_6 = arith.constant 0 : index
    %4 = vector.load %arg6[%c0_5, %c0_6] : memref<32x2xf32, #tpu.memory_space<vmem>>, vector<32x2xf32>
    %cst_7 = arith.constant dense<0.000000e+00> : vector<16x2xf32>
    %5 = tpu.matmul %2, %4, %cst_7 {dimension_numbers = #tpu.dot_dimension_numbers<[1], [0], [0], [1], [0, 0, 1, 1], [], []>} : vector<16x32xf32>, vector<32x2xf32>, vector<16x2xf32> -> vector<16x2xf32>
    %c0_8 = arith.constant 0 : index
    %c0_9 = arith.constant 0 : index
    %6 = vector.load %arg13[%c0_8, %c0_9] : memref<16x2xf32, #tpu.memory_space<vmem>>, vector<16x2xf32>
    tpu.vector_store %arg13[%c0_8, %c0_9], %5 {strides = array<i32>} : memref<16x2xf32, #tpu.memory_space<vmem>>, vector<16x2xf32>,
    %c0_10 = arith.constant 0 : index
    %c0_11 = arith.constant 0 : index
    %7 = vector.load %arg7[%c0_10, %c0_11] : memref<32x2xf32, #tpu.memory_space<vmem>>, vector<32x2xf32>
    %cst_12 = arith.constant dense<0.000000e+00> : vector<16x2xf32>
    %8 = tpu.matmul %2, %7, %cst_12 {dimension_numbers = #tpu.dot_dimension_numbers<[1], [0], [0], [1], [0, 0, 1, 1], [], []>} : vector<16x32xf32>, vector<32x2xf32>, vector<16x2xf32> -> vector<16x2xf32>
    %c0_13 = arith.constant 0 : index
    %c0_14 = arith.constant 0 : index
    %9 = vector.load %arg14[%c0_13, %c0_14] : memref<16x2xf32, #tpu.memory_space<vmem>>, vector<16x2xf32>
    tpu.vector_store %arg14[%c0_13, %c0_14], %8 {strides = array<i32>} : memref<16x2xf32, #tpu.memory_space<vmem>>, vector<16x2xf32>,
    %c0_15 = arith.constant 0 : index
    %c0_16 = arith.constant 0 : index
    %10 = vector.load %arg5[%c0_15, %c0_16] : memref<10x32xf32, #tpu.memory_space<vmem>>, vector<10x32xf32>
    %cst_17 = arith.constant dense<0.000000e+00> : vector<16x32xf32>
    %11 = tpu.matmul %0, %10, %cst_17 {dimension_numbers = #tpu.dot_dimension_numbers<[1], [0], [0], [1], [0, 0, 1, 1], [], []>} : vector<16x10xf32>, vector<10x32xf32>, vector<16x32xf32> -> vector<16x32xf32>
    %c0_18 = arith.constant 0 : index
    %c0_19 = arith.constant 0 : index
    %12 = vector.load %arg17[%c0_18, %c0_19] : memref<16x32xf32, #tpu.memory_space<vmem>>, vector<16x32xf32>
    tpu.vector_store %arg17[%c0_18, %c0_19], %11 {strides = array<i32>} : memref<16x32xf32, #tpu.memory_space<vmem>>, vector<16x32xf32>,
    %cst_20 = arith.constant 0.000000e+00 : f32
    %13 = vector.broadcast %cst_20 : f32 to vector<16x2xf32>
    %c0_21 = arith.constant 0 : index
    %c0_22 = arith.constant 0 : index
    %14 = vector.load %arg16[%c0_21, %c0_22] : memref<16x2xf32, #tpu.memory_space<vmem>>, vector<16x2xf32>
    tpu.vector_store %arg16[%c0_21, %c0_22], %13 {strides = array<i32>} : memref<16x2xf32, #tpu.memory_space<vmem>>, vector<16x2xf32>,
    %c0_i32 = arith.constant 0 : i32
    %c40_i32 = arith.constant 40 : i32
    %15 = arith.addi %c0_i32, %c40_i32 : i32
    %c1_i32 = arith.constant 1 : i32
    scf.for %arg18 = %c0_i32 to %15 step %c1_i32  : i32 {
      %c1_i32_57 = arith.constant 1 : i32
      %56 = arith.muli %arg18, %c1_i32_57 : i32
      %c0_i32_58 = arith.constant 0 : i32
      %57 = arith.addi %c0_i32_58, %56 : i32
      %58 = arith.index_cast %57 : i32 to index
      %59 = memref.load %arg1[%58] : memref<40xi32, #tpu.memory_space<smem>>
      %60 = arith.index_cast %57 : i32 to index
      %61 = memref.load %arg2[%60] : memref<40xi32, #tpu.memory_space<smem>>
      %62 = arith.index_cast %59 : i32 to index
      %c0_59 = arith.constant 0 : index
      %63 = vector.load %arg13[%62, %c0_59] : memref<16x2xf32, #tpu.memory_space<vmem>>, vector<1x2xf32>
      %64 = arith.index_cast %61 : i32 to index
      %c0_60 = arith.constant 0 : index
      %65 = vector.load %arg14[%64, %c0_60] : memref<16x2xf32, #tpu.memory_space<vmem>>, vector<1x2xf32>
      %66 = arith.addf %63, %65 : vector<1x2xf32>
      %67 = arith.index_cast %57 : i32 to index
      %c0_61 = arith.constant 0 : index
      %68 = vector.load %arg15[%67, %c0_61] : memref<40x2xf32, #tpu.memory_space<vmem>>, vector<1x2xf32>
      tpu.vector_store %arg15[%67, %c0_61], %66 {strides = array<i32>} : memref<40x2xf32, #tpu.memory_space<vmem>>, vector<1x2xf32>,
    }
    %c40_i32_23 = arith.constant 40 : i32
    %c0_24 = arith.constant 0 : index
    %c0_25 = arith.constant 0 : index
    %16 = vector.load %arg15[%c0_24, %c0_25] : memref<40x2xf32, #tpu.memory_space<vmem>>, vector<40x2xf32>
    %c0_26 = arith.constant 0 : index
    %c0_27 = arith.constant 0 : index
    %17 = vector.load %arg9[%c0_26, %c0_27] : memref<40x1xf32, #tpu.memory_space<vmem>>, vector<40x1xf32>
    %c0_28 = arith.constant 0 : index
    %c0_29 = arith.constant 0 : index
    %18 = vector.load %arg8[%c0_28, %c0_29] : memref<1x2xf32, #tpu.memory_space<vmem>>, vector<1x2xf32>
    %19 = vector.broadcast %17 : vector<40x1xf32> to vector<40x2xf32>
    %20 = vector.broadcast %18 : vector<1x2xf32> to vector<40x2xf32>
    %21 = arith.mulf %19, %20 : vector<40x2xf32>
    %22 = arith.addf %16, %21 : vector<40x2xf32>
    %cst_30 = arith.constant 0.000000e+00 : f32
    %23 = vector.broadcast %cst_30 : f32 to vector<40x2xf32>
    %24 = arith.cmpf ogt, %22, %23 : vector<40x2xf32>
    %cst_31 = arith.constant 2.000000e-01 : f32
    %25 = vector.broadcast %cst_31 : f32 to vector<40x2xf32>
    %26 = arith.mulf %25, %22 : vector<40x2xf32>
    %27 = arith.select %24, %22, %26 : vector<40x2xi1>, vector<40x2xf32>
    %28 = vector.shape_cast %27 : vector<40x2xf32> to vector<1x40x2xf32>
    %cst_32 = arith.constant dense<0xFF800000> : vector<1xf32>
    %29 = vector.multi_reduction <maximumf>, %28, %cst_32 [1, 2] : vector<1x40x2xf32> to vector<1xf32>
    %30 = vector.shape_cast %29 : vector<1xf32> to vector<1x1x1xf32>
    %31 = vector.extract %30[0, 0, 0] : f32 from vector<1x1x1xf32>
    %32 = vector.broadcast %31 : f32 to vector<40x2xf32>
    %33 = arith.subf %27, %32 : vector<40x2xf32>
    %34 = math.exp %33 : vector<40x2xf32>
    %c0_33 = arith.constant 0 : index
    %c0_34 = arith.constant 0 : index
    %35 = vector.load %arg15[%c0_33, %c0_34] : memref<40x2xf32, #tpu.memory_space<vmem>>, vector<40x2xf32>
    tpu.vector_store %arg15[%c0_33, %c0_34], %34 {strides = array<i32>} : memref<40x2xf32, #tpu.memory_space<vmem>>, vector<40x2xf32>,
    %c0_i32_35 = arith.constant 0 : i32
    %c40_i32_36 = arith.constant 40 : i32
    %36 = arith.addi %c0_i32_35, %c40_i32_36 : i32
    %c1_i32_37 = arith.constant 1 : i32
    scf.for %arg18 = %c0_i32_35 to %36 step %c1_i32_37  : i32 {
      %c1_i32_57 = arith.constant 1 : i32
      %56 = arith.muli %arg18, %c1_i32_57 : i32
      %c0_i32_58 = arith.constant 0 : i32
      %57 = arith.addi %c0_i32_58, %56 : i32
      %58 = arith.index_cast %57 : i32 to index
      %59 = memref.load %arg2[%58] : memref<40xi32, #tpu.memory_space<smem>>
      %60 = arith.index_cast %59 : i32 to index
      %c0_59 = arith.constant 0 : index
      %61 = vector.load %arg16[%60, %c0_59] : memref<16x2xf32, #tpu.memory_space<vmem>>, vector<1x2xf32>
      %62 = arith.index_cast %57 : i32 to index
      %c0_60 = arith.constant 0 : index
      %63 = vector.load %arg15[%62, %c0_60] : memref<40x2xf32, #tpu.memory_space<vmem>>, vector<1x2xf32>
      %64 = arith.addf %61, %63 : vector<1x2xf32>
      %65 = arith.index_cast %59 : i32 to index
      %c0_61 = arith.constant 0 : index
      %66 = vector.load %arg16[%65, %c0_61] : memref<16x2xf32, #tpu.memory_space<vmem>>, vector<1x2xf32>
      tpu.vector_store %arg16[%65, %c0_61], %64 {strides = array<i32>} : memref<16x2xf32, #tpu.memory_space<vmem>>, vector<1x2xf32>,
    }
    %c40_i32_38 = arith.constant 40 : i32
    %c0_39 = arith.constant 0 : index
    %c0_40 = arith.constant 0 : index
    %37 = vector.load %arg16[%c0_39, %c0_40] : memref<16x2xf32, #tpu.memory_space<vmem>>, vector<16x2xf32>
    %cst_41 = arith.constant 1.000000e-16 : f32
    %38 = vector.broadcast %cst_41 : f32 to vector<16x2xf32>
    %39 = arith.addf %37, %38 : vector<16x2xf32>
    %40 = tpu.reciprocal %39 {approx = true} : vector<16x2xf32> -> vector<16x2xf32>
    %c0_42 = arith.constant 0 : index
    %c0_43 = arith.constant 0 : index
    %41 = vector.load %arg16[%c0_42, %c0_43] : memref<16x2xf32, #tpu.memory_space<vmem>>, vector<16x2xf32>
    tpu.vector_store %arg16[%c0_42, %c0_43], %40 {strides = array<i32>} : memref<16x2xf32, #tpu.memory_space<vmem>>, vector<16x2xf32>,
    %c0_i32_44 = arith.constant 0 : i32
    %c40_i32_45 = arith.constant 40 : i32
    %42 = arith.addi %c0_i32_44, %c40_i32_45 : i32
    %c1_i32_46 = arith.constant 1 : i32
    scf.for %arg18 = %c0_i32_44 to %42 step %c1_i32_46  : i32 {
      %c1_i32_57 = arith.constant 1 : i32
      %56 = arith.muli %arg18, %c1_i32_57 : i32
      %c0_i32_58 = arith.constant 0 : i32
      %57 = arith.addi %c0_i32_58, %56 : i32
      %58 = arith.index_cast %57 : i32 to index
      %59 = memref.load %arg1[%58] : memref<40xi32, #tpu.memory_space<smem>>
      %60 = arith.index_cast %57 : i32 to index
      %61 = memref.load %arg2[%60] : memref<40xi32, #tpu.memory_space<smem>>
      %62 = arith.index_cast %57 : i32 to index
      %c0_59 = arith.constant 0 : index
      %63 = vector.load %arg15[%62, %c0_59] : memref<40x2xf32, #tpu.memory_space<vmem>>, vector<1x2xf32>
      %64 = arith.index_cast %61 : i32 to index
      %c0_60 = arith.constant 0 : index
      %65 = vector.load %arg16[%64, %c0_60] : memref<16x2xf32, #tpu.memory_space<vmem>>, vector<1x2xf32>
      %66 = arith.mulf %63, %65 : vector<1x2xf32>
      %67 = vector.extract_strided_slice %66 {offsets = [0, 0], sizes = [1, 1], strides = [1, 1]} : vector<1x2xf32> to vector<1x1xf32>
      %68 = vector.shape_cast %67 : vector<1x1xf32> to vector<1x1xf32>
      %69 = vector.broadcast %68 : vector<1x1xf32> to vector<1x16xf32>
      %70 = vector.extract_strided_slice %66 {offsets = [0, 1], sizes = [1, 1], strides = [1, 1]} : vector<1x2xf32> to vector<1x1xf32>
      %71 = vector.shape_cast %70 : vector<1x1xf32> to vector<1x1xf32>
      %72 = vector.broadcast %71 : vector<1x1xf32> to vector<1x16xf32>
      %73 = tpu.concatenate %69, %72 in 1 : vector<1x16xf32>, vector<1x16xf32> -> vector<1x32xf32>
      %74 = arith.index_cast %61 : i32 to index
      %c0_61 = arith.constant 0 : index
      %75 = vector.load %arg17[%74, %c0_61] : memref<16x32xf32, #tpu.memory_space<vmem>>, vector<1x32xf32>
      %76 = arith.index_cast %59 : i32 to index
      %c0_62 = arith.constant 0 : index
      %77 = vector.load %arg12[%76, %c0_62] : memref<16x32xf32, #tpu.memory_space<vmem>>, vector<1x32xf32>
      %78 = arith.mulf %77, %73 : vector<1x32xf32>
      %79 = arith.addf %75, %78 : vector<1x32xf32>
      %80 = arith.index_cast %61 : i32 to index
      %c0_63 = arith.constant 0 : index
      %81 = vector.load %arg17[%80, %c0_63] : memref<16x32xf32, #tpu.memory_space<vmem>>, vector<1x32xf32>
      tpu.vector_store %arg17[%80, %c0_63], %79 {strides = array<i32>} : memref<16x32xf32, #tpu.memory_space<vmem>>, vector<1x32xf32>,
    }
    %c40_i32_47 = arith.constant 40 : i32
    %c0_48 = arith.constant 0 : index
    %c0_49 = arith.constant 0 : index
    %43 = vector.load %arg17[%c0_48, %c0_49] : memref<16x32xf32, #tpu.memory_space<vmem>>, vector<16x32xf32>
    %c0_50 = arith.constant 0 : index
    %c0_51 = arith.constant 0 : index
    %44 = vector.load %arg10[%c0_50, %c0_51] : memref<1x32xf32, #tpu.memory_space<vmem>>, vector<1x32xf32>
    %45 = vector.broadcast %44 : vector<1x32xf32> to vector<16x32xf32>
    %46 = arith.addf %43, %45 : vector<16x32xf32>
    %cst_52 = arith.constant 0.000000e+00 : f32
    %47 = vector.broadcast %cst_52 : f32 to vector<16x32xf32>
    %48 = arith.cmpf ogt, %46, %47 : vector<16x32xf32>
    %cst_53 = arith.constant 0.000000e+00 : f32
    %49 = vector.broadcast %cst_53 : f32 to vector<16x32xf32>
    %50 = arith.minimumf %46, %49 : vector<16x32xf32>
    %51 = math.exp %50 : vector<16x32xf32>
    %cst_54 = arith.constant 1.000000e+00 : f32
    %52 = vector.broadcast %cst_54 : f32 to vector<16x32xf32>
    %53 = arith.subf %51, %52 : vector<16x32xf32>
    %54 = arith.select %48, %46, %53 : vector<16x32xi1>, vector<16x32xf32>
    %c0_55 = arith.constant 0 : index
    %c0_56 = arith.constant 0 : index
    %55 = vector.load %arg11[%c0_55, %c0_56] : memref<16x32xf32, #tpu.memory_space<vmem>>, vector<16x32xf32>
    tpu.vector_store %arg11[%c0_55, %c0_56], %54 {strides = array<i32>} : memref<16x32xf32, #tpu.memory_space<vmem>>, vector<16x32xf32>,
    return
  }
  func.func @transform_0(%arg0: i32, %arg1: memref<40xi32, #tpu.memory_space<smem>>, %arg2: memref<40xi32, #tpu.memory_space<smem>>) -> (i32, i32) {
    %c0_i32 = arith.constant 0 : i32
    %c0_i32_0 = arith.constant 0 : i32
    %c0_i32_1 = arith.constant 0 : i32
    return %c0_i32, %c0_i32_0 : i32, i32
  }
  func.func @transform_1(%arg0: i32, %arg1: memref<40xi32, #tpu.memory_space<smem>>, %arg2: memref<40xi32, #tpu.memory_space<smem>>) -> (i32, i32) {
    %c0_i32 = arith.constant 0 : i32
    %c0_i32_0 = arith.constant 0 : i32
    %c0_i32_1 = arith.constant 0 : i32
    return %c0_i32, %c0_i32_0 : i32, i32
  }
  func.func @transform_2(%arg0: i32, %arg1: memref<40xi32, #tpu.memory_space<smem>>, %arg2: memref<40xi32, #tpu.memory_space<smem>>) -> (i32, i32) {
    %c0_i32 = arith.constant 0 : i32
    %c0_i32_0 = arith.constant 0 : i32
    %c0_i32_1 = arith.constant 0 : i32
    return %c0_i32, %c0_i32_0 : i32, i32
  }
  func.func @transform_3(%arg0: i32, %arg1: memref<40xi32, #tpu.memory_space<smem>>, %arg2: memref<40xi32, #tpu.memory_space<smem>>) -> (i32, i32) {
    %c0_i32 = arith.constant 0 : i32
    %c0_i32_0 = arith.constant 0 : i32
    %c0_i32_1 = arith.constant 0 : i32
    return %c0_i32, %c0_i32_0 : i32, i32
  }
  func.func @transform_4(%arg0: i32, %arg1: memref<40xi32, #tpu.memory_space<smem>>, %arg2: memref<40xi32, #tpu.memory_space<smem>>) -> (i32, i32) {
    %c0_i32 = arith.constant 0 : i32
    %c0_i32_0 = arith.constant 0 : i32
    %c0_i32_1 = arith.constant 0 : i32
    return %c0_i32, %c0_i32_0 : i32, i32
  }
  func.func @transform_5(%arg0: i32, %arg1: memref<40xi32, #tpu.memory_space<smem>>, %arg2: memref<40xi32, #tpu.memory_space<smem>>) -> (i32, i32) {
    %c0_i32 = arith.constant 0 : i32
    %c0_i32_0 = arith.constant 0 : i32
    %c0_i32_1 = arith.constant 0 : i32
    return %c0_i32, %c0_i32_0 : i32, i32
  }
  func.func @transform_6(%arg0: i32, %arg1: memref<40xi32, #tpu.memory_space<smem>>, %arg2: memref<40xi32, #tpu.memory_space<smem>>) -> (i32, i32) {
    %c0_i32 = arith.constant 0 : i32
    %c0_i32_0 = arith.constant 0 : i32
    %c0_i32_1 = arith.constant 0 : i32
    return %c0_i32, %c0_i32_0 : i32, i32
  }
  func.func @transform_7(%arg0: i32, %arg1: memref<40xi32, #tpu.memory_space<smem>>, %arg2: memref<40xi32, #tpu.memory_space<smem>>) -> (i32, i32) {
    %c0_i32 = arith.constant 0 : i32
    %c0_i32_0 = arith.constant 0 : i32
    %c0_i32_1 = arith.constant 0 : i32
    return %c0_i32, %c0_i32_0 : i32, i32
  }
  func.func @transform_8(%arg0: i32, %arg1: memref<40xi32, #tpu.memory_space<smem>>, %arg2: memref<40xi32, #tpu.memory_space<smem>>) -> (i32, i32) {
    %c0_i32 = arith.constant 0 : i32
    %c0_i32_0 = arith.constant 0 : i32
    %c0_i32_1 = arith.constant 0 : i32
    return %c0_i32, %c0_i32_0 : i32, i32
  }
}

</mosaic_0001>

<bundles_post_ra>
// kernel: tpu_custom_call.1
= control target key start
LH: loop header
LB: loop body
LE: loop exit
PB: predicated region body
PF: predicated region fallthrough
CT: control target
= control target key end

     0   :  { %s1056_s0 = inlined_call_operand.vmem [shape: s32[40], index: 0, kind: input, shape index: {}]   ;;  %s1057_s2 = inlined_call_operand.vmem [shape: f32[16,10], index: 2, kind: input, shape index: {}]   ;;  %s1058_s3 = inlined_call_operand.vmem [shape: f32[10,32], index: 3, kind: input, shape index: {}]   ;;  %s1059_s4 = inlined_call_operand.vmem [shape: f32[10,32], index: 4, kind: input, shape index: {}]   ;;  %s1060_s5 = inlined_call_operand.vmem [shape: f32[32,2], index: 5, kind: input, shape index: {}]   ;;  %s1061_s6 = inlined_call_operand.vmem [shape: f32[32,2], index: 6, kind: input, shape index: {}]   ;;  %s1062_s7 = inlined_call_operand.vmem [shape: f32[1,2], index: 7, kind: input, shape index: {}]   ;;  %s1063_s8 = inlined_call_operand.vmem [shape: f32[40,1], index: 8, kind: input, shape index: {}]   ;;  %s1064_s9 = inlined_call_operand.vmem [shape: f32[1,32], index: 9, kind: input, shape index: {}]   ;;  %s1065_s10 = inlined_call_operand.hbm [shape: f32[16,32], index: 10, kind: output, shape index: {}]   ;;  %s1066_s1 = inlined_call_operand.vmem [shape: s32[40], index: 1, kind: input, shape index: {}]  }
   0x1   :  { %s15_s15 = sshll.u32 %s1056_s0, 4  ;;  %s19_s18 = sshll.u32 %s1066_s1, 4  ;;  %s16_s15 = int_to_ptr.vmem [resolvable:$true] %s15_s15  ;;  %s20_s18 = int_to_ptr.vmem [resolvable:$true] %s19_s18 }
   0x2   :  { %s785_s19 = scalar_lea.vmem %s16_s15, 16  ;;  %p790_p1 = scmp.lt.s32.totalorder %s16_s15, %s16_s15 }
   0x3   :  { %p786_p0 = scmp.ne.s32.totalorder %s16_s15, %s785_s19  ;;  %p791_p2 = scmp.lt.s32.totalorder %s785_s19, %s785_s19 }
   0x5   :  { %p792_p3 = por %p791_p2, %p790_p1 }
   0x7   :  { %p793_p4 = pnand %p792_p3, %p786_p0 }
   0x9   :  { %796 = shalt.err (!%p793_p4)  }
   0xa   :  { %s859_s20 = smov [#allocation9]   ;;  %s797_s21 = scalar_lea.vmem %s20_s18, 16 }
   0xb   :  { %18 = dma.vmem_to_smem %s16_s15, 16, %s859_s20, [#allocation8] }
   0xc   :  { %p798_p5 = scmp.ne.s32.totalorder %s20_s18, %s797_s21  ;;  %p802_p6 = scmp.lt.s32.totalorder %s20_s18, %s20_s18 }
   0xd   :  { %p803_p7 = scmp.lt.s32.totalorder %s797_s21, %s797_s21 }
   0xf   :  { %p804_p8 = por %p803_p7, %p802_p6 }
  0x11   :  { %p805_p9 = pnand %p804_p8, %p798_p5 }
  0x13   :  { %808 = shalt.err (!%p805_p9)  }
  0x14   :  { %s860_s0 = smov [#allocation10]  }
  0x15   :  { %22 = dma.vmem_to_smem %s20_s18, 16, %s860_s0, [#allocation8] }
  0x16   :  { %843 = dma.done.wait [#allocation8], 32 }
  0x17   :  { %844 = vsyncadd [#allocation8], 4294967264 }
  0x18   :  { %24 = sfence }
  0x19   :  { %25 = vsyncpa [#allocation12], 0  ;;  %v44_v0 = vld [vmem:[%s1058_s3] sm:$0xff]  ;;  %v45_v1 = vld [vmem:[%s1058_s3 + $0x8] sm:$0x3]  ;;  %vm53_vm0 = vcmask 1041408  }
  0x1a   :  { %v699_v2 = vpack.c.bf16 %v45_v1, %v44_v0  ;;  %v42_v3 = vld [vmem:[%s1057_s2] sm:$0xff]  ;;  %vm46_vm1 = vcmask 80896   ;;  %vm861_vm2 = vmmov 1   ;;  %v136_v6 = vld [vmem:[%s1060_s5 + $0x8] sm:$0xff]  ;;  %v137_v10 = vld [vmem:[%s1060_s5 + $0x10] sm:$0xff]  ;;  %vm132_vm4 = vcmask 261120  }
  0x1b   :  { %v135_v4 = vld [vmem:[%s1060_s5] sm:$0xff]  ;;  %vm942_vm3 = vmpackc.low %vm53_vm0, %vm861_vm2  ;;  %667 = vmatprep.mubr.msk.f32.mxu0 %vm46_vm1, %v42_v3  ;;  %v224_v9 = vld [vmem:[%s1061_s6 + $0x8] sm:$0xff]  ;;  %vm220_vm5 = vcmask 15360   ;;  %v862_v23 = vmov 0.0  }
  0x1c   :  { %v223_v7 = vld [vmem:[%s1061_s6] sm:$0xff]  ;;  %701 = vmatprep.subr.msk.bf16.mxu0 %vm942_vm3, %v699_v2  ;;  %v705_v8 = vpack.c.bf16 %v136_v6, %v135_v4  ;;  %v138_v11 = vld [vmem:[%s1060_s5 + $0x18] sm:$0xff]  ;;  %v43_v12 = vld [vmem:[%s1057_s2 + $0x8] sm:$0xff]  ;;  %386 = vst.msk [vmem:[#allocation6] sm:$0xff] %vm220_vm5, %v862_v23 }
  0x1d   :  { %704 = vmatpush3.bf16.msk.msra.mxu0 %vm942_vm3, %v699_v2  ;;  %v713_v13 = vpack.c.bf16 %v224_v9, %v223_v7  ;;  %v709_v14 = vpack.c.bf16 %v138_v11, %v137_v10  ;;  %v225_v15 = vld [vmem:[%s1061_s6 + $0x10] sm:$0xff]  ;;  %v226_v16 = vld [vmem:[%s1061_s6 + $0x18] sm:$0xff]  ;;  %v304_v18 = vld [vmem:[%s1059_s4] sm:$0xff]  ;;  %387 = vst.msk [vmem:[#allocation6 + $0x8] sm:$0xff] %vm220_vm5, %v862_v23 }
  0x1e   :  { %706 = vmatprep.subr.bf16.mxu1 %v705_v8  ;;  %v717_v17 = vpack.c.bf16 %v226_v16, %v225_v15  ;;  %v305_v19 = vld [vmem:[%s1059_s4 + $0x8] sm:$0x3]  ;;  %s847_s4 = smov 0  }
  0x1f   :  { %708 = vmatpush3.bf16.msra.mxu1 %v705_v8  ;;  %714 = vmatprep.subr.bf16.mxu0 %v713_v13  ;;  %v721_v20 = vpack.c.bf16 %v305_v19, %v304_v18 }
  0x20   :  { %668 = vmatmul.mubr.msk.f32.vlgmr.msra.gmra.mrb[0].mxu0 %vm46_vm1, %v43_v12  ;;  %710 = vmatprep.subr.bf16.mxu1 %v709_v14 }
  0x21   :  { %716 = vmatpush3.bf16.msra.mxu0 %v713_v13 }
  0x22   :  { %718 = vmatprep.subr.bf16.mxu0 %v717_v17 }
  0x23   :  { %712 = vmatpush3.bf16.msra.mxu1 %v709_v14 }
  0x24   :  { %723 = vmatprep.subr.msk.bf16.mxu1 %vm942_vm3, %v721_v20 }
  0x25   :  { %720 = vmatpush3.bf16.msra.mxu0 %v717_v17 }
  0xf3   :  { %v669_v21 = vpop.f32.mrb[0].mxu0 }
  0xf4   :  { %134 = vst.msk [vmem:[#allocation2 + $0x8] sm:$0xff] %vm132_vm4, %v669_v21  ;;  %v123_v22 = vpop.f32.mrb[1].mxu0 }
  0xf5   :  { %133 = vst.msk [vmem:[#allocation2] sm:$0xff] %vm132_vm4, %v123_v22  ;;  %678 = vmatprep.mubr.msk.f32.mxu1 %vm132_vm4, %v123_v22  ;;  %689 = vmatprep.mubr.msk.f32.mxu0 %vm132_vm4, %v123_v22 }
  0xf6   :  { %679 = vmatmul.mubr.msk.f32.vlgmr.msra.gmra.mrb[0].mxu1 %vm132_vm4, %v669_v21  ;;  %690 = vmatmul.mubr.msk.f32.vlgmr.msra.gmra.mrb[2].mxu0 %vm132_vm4, %v669_v21 }
  0xf7   :  { %726 = vmatpush3.bf16.msk.msra.mxu1 %vm942_vm3, %v721_v20  ;;  %696 = vmatprep.mubr.msk.f32.mxu1 %vm46_vm1, %v42_v3 }
  0xfa   :  { %697 = vmatmul.mubr.msk.f32.vlgmr.msra.gmra.mrb[2].mxu1 %vm46_vm1, %v43_v12 }
 0x1c9   :  { %v680_v24 = vpop.f32.mrb[0].mxu1  ;;  %v691_v25 = vpop.f32.mrb[2].mxu0 }
 0x1ca   :  { %222 = vst.msk [vmem:[#allocation3 + $0x8] sm:$0xff] %vm220_vm5, %v680_v24  ;;  %303 = vst.msk [vmem:[#allocation4 + $0x8] sm:$0xff] %vm220_vm5, %v691_v25  ;;  %v211_v26 = vpop.f32.mrb[1].mxu1  ;;  %v293_v27 = vpop.f32.mrb[3].mxu0 }
 0x1cb   :  { %221 = vst.msk [vmem:[#allocation3] sm:$0xff] %vm220_vm5, %v211_v26  ;;  %302 = vst.msk [vmem:[#allocation4] sm:$0xff] %vm220_vm5, %v293_v27 }
 0x1cd   :  { %v698_v28 = vpop.f32.mrb[2].mxu1 }
 0x1ce   :  { %385 = vst.msk [vmem:[#allocation7 + $0x8] sm:$0xff] %vm132_vm4, %v698_v28  ;;  %v375_v29 = vpop.f32.mrb[3].mxu1 }
 0x1cf   :  { %384 = vst.msk [vmem:[#allocation7] sm:$0xff] %vm132_vm4, %v375_v29 }
 0x1d0 LB: > { %s394_s6 = sld [smem:[#allocation9 + %s849_s4]]  ;;  %vm402_vm6 = vcmask 8192   ;;  %s401_s27 = scalar_lea.vmem [#allocation5], %s849_s4  ;;  %s849_s4 = sphi %s847_s4, %s393_s4  }
 0x1d1   : > { %s395_s24 = sld [smem:[#allocation10 + %s849_s4]]  ;;  %s393_s4 = sadd.s32 1, %s849_s4  }
 0x1d2   : > { %p390_p10 = scmp.ge.s32.totalorder %s393_s4, 40  }
 0x1d3   :  { %v410_v33 = vld [vmem:[%s1063_s8 + $0x8] sm:$0xff] (%p390_p10)  ;;  %v409_v34 = vld [vmem:[%s1063_s8] sm:$0xff] (%p390_p10)  ;;  %v863_v35 = vmov (%p390_p10), 0   ;;  %v411_v36 = vld [vmem:[%s1063_s8 + $0x10] sm:$0xff] (%p390_p10) }
 0x1d4   :  { %764 = vset.pattern.permute.xlu1 (%p390_p10), %v863_v35  ;;  %763 = vset.pattern.permute.xlu0 (%p390_p10), %v863_v35  ;;  %v413_v37 = vld [vmem:[%s1063_s8 + $0x20] sm:$0xff] (%p390_p10)  ;;  %v412_v38 = vld [vmem:[%s1063_s8 + $0x18] sm:$0xff] (%p390_p10)  ;;  %s851_s8 = smov (%p390_p10), 0  }
 0x1d5   :  { %392 = sbr.rel (!%p390_p10) target bundleno = 464 (0x1d0), region = 82  ;;  %422 = vperm.xlu1 (%p390_p10), %764, %v410_v33   ;;  %417 = vperm.xlu0 (%p390_p10), %763, %v409_v34   ;;  %v639_v39 = vld [vmem:[%s1062_s7] ss:$0 sm:$0xff] (%p390_p10) }
 0x1d6   : > { %s396_s25 = scalar_lea.vmem [#allocation3], %s394_s6 }
 0x1d7   : > { %v397_v30 = vld [vmem:[%s396_s25] sm:$0x1]  ;;  %s398_s26 = scalar_lea.vmem [#allocation4], %s395_s24 }
 0x1d8   : > { %v399_v31 = vld [vmem:[%s398_s26] sm:$0x1] }
 0x1d9   : > { %v400_v32 = vadd.f32 %v399_v31, %v397_v30  ;;  %427 = vperm.xlu1 (%p390_p10), %764, %v411_v36   ;;  %437 = vperm.xlu0 (%p390_p10), %763, %v413_v37  }
 0x1db   : > { %403 = vst.msk [vmem:[%s401_s27] sm:$0x1] %vm402_vm6, %v400_v32 }
 0x1dd   :  { %432 = vperm.xlu0 %763, %v412_v38  }
 0x1e2   :  { %v404_v42 = vld [vmem:[#allocation5] sm:$0xff]  ;;  %v405_v43 = vld [vmem:[#allocation5 + $0x8] sm:$0xff]  ;;  %v406_v51 = vld [vmem:[#allocation5 + $0x10] sm:$0xff] }
 0x1e3   :  { %v408_v52 = vld [vmem:[#allocation5 + $0x20] sm:$0xff]  ;;  %v407_v59 = vld [vmem:[#allocation5 + $0x18] sm:$0xff] }
 0x254   :  { %v423_v40 = vpop.permute.xlu1 %422  ;;  %v418_v41 = vpop.permute.xlu0 %417 }
 0x255   :  { %v447_v44 = vmul.f32 %v639_v39, %v423_v40  ;;  %v446_v45 = vmul.f32 %v639_v39, %v418_v41 }
 0x257   :  { %v451_v46 = vadd.f32 %v446_v45, %v404_v42  ;;  %v452_v47 = vadd.f32 %v447_v44, %v405_v43 }
 0x258   :  { %v428_v48 = vpop.permute.xlu1 %427  ;;  %v438_v49 = vpop.permute.xlu0 %437 }
 0x259   :  { %v461_v50 = vmul.f32 0.2, %v451_v46  ;;  %vm456_vm7 = vcmp.gt.f32.partialorder %v451_v46, 0.0  ;;  %v448_v53 = vmul.f32 %v639_v39, %v428_v48  ;;  %v450_v54 = vmul.f32 %v639_v39, %v438_v49 }
 0x25a   :  { %v462_v55 = vmul.f32 0.2, %v452_v47  ;;  %vm457_vm8 = vcmp.gt.f32.partialorder %v452_v47, 0.0 }
 0x25b   :  { %v453_v56 = vadd.f32 %v448_v53, %v406_v51  ;;  %v455_v57 = vadd.f32 %v450_v54, %v408_v52  ;;  %v466_v60 = vsel %vm456_vm7, %v451_v46, %v461_v50 }
 0x25c   :  { %v433_v58 = vpop.permute.xlu0 %432  ;;  %v467_v2 = vsel %vm457_vm8, %v452_v47, %v462_v55  ;;  %v471_v3 = vsel %vm220_vm5, %v466_v60, -inf }
 0x25d   :  { %v449_v61 = vmul.f32 %v639_v39, %v433_v58  ;;  %vm458_vm9 = vcmp.gt.f32.partialorder %v453_v56, 0.0  ;;  %v463_v62 = vmul.f32 0.2, %v453_v56  ;;  %vm460_vm10 = vcmp.gt.f32.partialorder %v455_v57, 0.0 }
 0x25e   :  { %v465_v63 = vmul.f32 0.2, %v455_v57  ;;  %v472_v9 = vsel %vm220_vm5, %v467_v2, -inf }
 0x25f   :  { %v454_v0 = vadd.f32 %v449_v61, %v407_v59  ;;  %v468_v5 = vsel %vm458_vm9, %v453_v56, %v463_v62 }
 0x260   :  { %v470_v1 = vsel %vm460_vm10, %v455_v57, %v465_v63  ;;  %v473_v10 = vsel %vm220_vm5, %v468_v5, -inf }
 0x261   :  { %vm459_vm11 = vcmp.gt.f32.partialorder %v454_v0, 0.0  ;;  %v464_v4 = vmul.f32 0.2, %v454_v0  ;;  %v475_v6 = vsel %vm220_vm5, %v470_v1, -inf }
 0x262   :  { %v476_v7 = vmax.f32 %v471_v3, %v475_v6 }
 0x263   :  { %v469_v8 = vsel %vm459_vm11, %v454_v0, %v464_v4 }
 0x264   :  { %v474_v11 = vsel %vm220_vm5, %v469_v8, -inf  ;;  %v477_v12 = vmax.f32 %v476_v7, %v472_v9 }
 0x265   :  { %v478_v13 = vmax.f32 %v473_v10, %v474_v11 }
 0x267   :  { %v479_v14 = vmax.f32 %v477_v12, %v478_v13 }
 0x269   :  { %480 = vmax.xlane.f32.xlu1 %v479_v14 }
 0x2f6   :  { %v481_v15 = vpop.xlane.xlu1 %480 }
 0x2f7   :  { %v482_v16 = vrot.slane %v481_v15, 4 }
 0x2f9   :  { %v483_v17 = vmax.f32 %v481_v15, %v482_v16 }
 0x2fb   :  { %v484_v18 = vrot.slane %v483_v17, 2 }
 0x2fd   :  { %v485_v19 = vmax.f32 %v483_v17, %v484_v18 }
 0x2ff   :  { %v486_v20 = vrot.slane %v485_v19, 1 }
 0x301   :  { %v487_v21 = vmax.f32 %v485_v19, %v486_v20 }
 0x303   :  { %727 = vpush %v487_v21 }
 0x334   :  { %s728_s7 = spop %727 }
 0x335   :  { %v489_v22 = vstv %s728_s7 }
 0x336   :  { %v490_v23 = vsub.f32 %v466_v60, %v489_v22  ;;  %v491_v24 = vsub.f32 %v467_v2, %v489_v22  ;;  %v492_v25 = vsub.f32 %v468_v5, %v489_v22  ;;  %v493_v26 = vsub.f32 %v469_v8, %v489_v22 }
 0x337   :  { %v494_v27 = vsub.f32 %v470_v1, %v489_v22 }
 0x338   :  { %v495_v28 = vmul.f32 1.442695, %v490_v23  ;;  %v497_v29 = vmul.f32 1.442695, %v491_v24  ;;  %v499_v30 = vmul.f32 1.442695, %v492_v25 }
 0x339   :  { %v501_v31 = vmul.f32 1.442695, %v493_v26  ;;  %v503_v32 = vmul.f32 1.442695, %v494_v27 }
 0x33a   :  { %765 = vpow2.f32 %v495_v28 }
 0x33b   :  { %767 = vpow2.f32 %v497_v29 }
 0x33c   :  { %769 = vpow2.f32 %v499_v30 }
 0x33d   :  { %771 = vpow2.f32 %v501_v31 }
 0x33e   :  { %773 = vpow2.f32 %v503_v32 }
 0x344   :  { %v766_v33 = vpop.eup %765 }
 0x345   :  { %v768_v34 = vpop.eup %767  ;;  %505 = vst.msk [vmem:[#allocation5] sm:$0xff] %vm220_vm5, %v766_v33 }
 0x346   :  { %v770_v35 = vpop.eup %769  ;;  %506 = vst.msk [vmem:[#allocation5 + $0x8] sm:$0xff] %vm220_vm5, %v768_v34 }
 0x347   :  { %v772_v36 = vpop.eup %771  ;;  %507 = vst.msk [vmem:[#allocation5 + $0x10] sm:$0xff] %vm220_vm5, %v770_v35 }
 0x348   :  { %v774_v37 = vpop.eup %773  ;;  %508 = vst.msk [vmem:[#allocation5 + $0x18] sm:$0xff] %vm220_vm5, %v772_v36 }
 0x349   :  { %509 = vst.msk [vmem:[#allocation5 + $0x20] sm:$0xff] %vm220_vm5, %v774_v37 }
 0x34a LB: > { %s516_s19 = sld [smem:[#allocation10 + %s853_s8]]  ;;  %s519_s20 = scalar_lea.vmem [#allocation5], %s853_s8  ;;  %s853_s8 = sphi %s851_s8, %s515_s8  }
 0x34b   : > { %s515_s8 = sadd.s32 1, %s853_s8  }
 0x34c   : > { %p512_p11 = scmp.ge.s32.totalorder %s515_s8, 40  }
 0x34d   :  { %s1034_s0 = smov (%p512_p11), 0  }
 0x34e   :  { %514 = sbr.rel (!%p512_p11) target bundleno = 842 (0x34a), region = 93 }
 0x350   : > { %v520_v38 = vld [vmem:[%s519_s20] sm:$0x1]  ;;  %s517_s21 = scalar_lea.vmem [#allocation6], %s516_s19 }
 0x351   : > { %v518_v39 = vld [vmem:[%s517_s21] sm:$0x1] }
 0x352   : > { %v521_v40 = vadd.f32 %v520_v38, %v518_v39 }
 0x354   : > { %523 = vst.msk [vmem:[%s517_s21] sm:$0x1] %vm402_vm6, %v521_v40 }
 0x35b   :  { %v524_v41 = vld [vmem:[#allocation6] sm:$0xff]  ;;  %v525_v42 = vld [vmem:[#allocation6 + $0x8] sm:$0xff] }
 0x35c   :  { %v526_v43 = vadd.f32 1e-16, %v524_v41  ;;  %v527_v44 = vadd.f32 1e-16, %v525_v42 }
 0x35e   :  { %775 = vrcp.f32 %v526_v43 }
 0x35f   :  { %777 = vrcp.f32 %v527_v44 }
 0x368   :  { %v776_v45 = vpop.eup %775 }
 0x369   :  { %v778_v46 = vpop.eup %777  ;;  %530 = vst.msk [vmem:[#allocation6] sm:$0xff] %vm220_vm5, %v776_v45 }
 0x36a   :  { %531 = vst.msk [vmem:[#allocation6 + $0x8] sm:$0xff] %vm220_vm5, %v778_v46 }
 0x36b LB: > { %v864_v47 = vmov 0   ;;  %s539_s1 = sld [smem:[#allocation10 + %s857_s0]]  ;;  %s540_s2 = scalar_lea.vmem [#allocation5], %s857_s0  ;;  %v865_v51 = vmov 1   ;;  %vm554_vm12 = vcmask 130048   ;;  %vm562_vm13 = vcmask 253952   ;;  %s857_s0 = sphi %s1034_s0, %s537_s0  }
 0x36c   : > { %779 = vset.pattern.permute.xlu0 %v864_v47  ;;  %v541_v48 = vld [vmem:[%s540_s2] sm:$0x1]  ;;  %s538_s22 = sld [smem:[#allocation9 + %s857_s0]]  ;;  %s537_s0 = sadd.s32 1, %s857_s0  }
 0x36d   : > { %p534_p12 = scmp.ge.s32.totalorder %s537_s0, 40  }
 0x36e   :  { %v640_v60 = vld [vmem:[%s1064_s9] ss:$0 sm:$0xff] (%p534_p12)  ;;  %s866_s25 = smov (%p534_p12), [#allocation11]  }
 0x36f   :  { %s594_s26 = sshll.u32 (%p534_p12), %s866_s25, 4  ;;  %s595_s26 = int_to_ptr.vmem [resolvable:$true] %s594_s26 }
 0x370   :  { %s809_s9 = scalar_lea.vmem (%p534_p12), %s595_s26, 256  ;;  %p814_p0 = scmp.lt.s32.totalorder (%p534_p12), %s595_s26, %s595_s26 }
 0x371   : > { %s542_s5 = scalar_lea.vmem [#allocation6], %s539_s1  ;;  %s556_s4 = scalar_lea.vmem [#allocation7], %s539_s1 }
 0x372   : > { %v543_v49 = vld [vmem:[%s542_s5] sm:$0x1]  ;;  %s558_s23 = scalar_lea.vmem [#allocation2], %s538_s22  ;;  %p810_p13 = scmp.ne.s32.totalorder (%p534_p12), %s595_s26, %s809_s9 }
 0x373   : > { %v544_v50 = vmul.f32 %v543_v49, %v541_v48  ;;  %v559_v53 = vld [vmem:[%s558_s23] sm:$0x1]  ;;  %p815_p1 = scmp.lt.s32.totalorder (%p534_p12), %s809_s9, %s809_s9 }
 0x374   : > { %v557_v55 = vld [vmem:[%s556_s4] sm:$0x1] }
 0x375   : > { %547 = vperm.xlu0 %779, %v544_v50   ;;  %p816_p2 = por (%p534_p12), %p815_p1, %p814_p0 }
 0x377   :  { %p817_p3 = pnand (%p534_p12), %p816_p2, %p810_p13 }
 0x379   : > { %780 = vset.pattern.permute.xlu0 %v865_v51 }
 0x37a   : > { %551 = vperm.xlu0 %780, %v544_v50  }
 0x3f4   : > { %v548_v52 = vpop.permute.xlu0 %547 }
 0x3f9   : > { %v552_v54 = vpop.permute.xlu0 %551  ;;  %536 = sbr.rel (!%p534_p12) target bundleno = 875 (0x36b), region = 104 }
 0x3fa   : > { %v555_v56 = vsel %vm554_vm12, %v548_v52, %v552_v54 }
 0x3fb   : > { %v560_v57 = vmul.f32 %v559_v53, %v555_v56 }
 0x3fd   : > { %v561_v58 = vadd.f32 %v560_v57, %v557_v55 }
 0x3ff   : > { %563 = vst.msk [vmem:[%s556_s4] sm:$0x1] %vm562_vm13, %v561_v58 }
 0x406   :  { %v564_v59 = vld [vmem:[#allocation7] sm:$0xff]  ;;  %v565_v61 = vld [vmem:[#allocation7 + $0x8] sm:$0xff] }
 0x407   :  { %v573_v62 = vadd.f32 %v640_v60, %v564_v59  ;;  %v574_v63 = vadd.f32 %v640_v60, %v565_v61 }
 0x409   :  { %v577_v0 = vmin.f32 %v573_v62, 0.0  ;;  %v578_v1 = vmin.f32 %v574_v63, 0.0  ;;  %vm575_vm14 = vcmp.gt.f32.partialorder %v573_v62, 0.0  ;;  %vm576_vm15 = vcmp.gt.f32.partialorder %v574_v63, 0.0 }
 0x40b   :  { %v579_v2 = vmul.f32 1.442695, %v577_v0  ;;  %v581_v3 = vmul.f32 1.442695, %v578_v1 }
 0x40d   :  { %781 = vpow2.f32 %v579_v2 }
 0x40e   :  { %783 = vpow2.f32 %v581_v3 }
 0x417   :  { %v782_v4 = vpop.eup %781 }
 0x418   :  { %v784_v5 = vpop.eup %783  ;;  %v641_v6 = vadd.f32 -1.0, %v782_v4 }
 0x419   :  { %v642_v7 = vadd.f32 -1.0, %v784_v5 }
 0x41a   :  { %v585_v8 = vsel %vm575_vm14, %v573_v62, %v641_v6 }
 0x41b   :  { %587 = vst.msk [vmem:[#allocation11] sm:$0xff] %vm132_vm4, %v585_v8  ;;  %v586_v9 = vsel %vm576_vm15, %v574_v63, %v642_v7 }
 0x41c   :  { %588 = vst.msk [vmem:[#allocation11 + $0x8] sm:$0xff] %vm132_vm4, %v586_v9 }
 0x41d   :  { %820 = shalt.err (!%p817_p3)
}
 0x41e   :  { %s821_s29 = scalar_lea.hbm %s1065_s10, 256 }
 0x41f   :  { %p822_p4 = scmp.ne.s32.totalorder %s1065_s10, %s821_s29  ;;  %p825_p5 = scmp.lt.u32.totalorder %s821_s29, %s1065_s10 }
 0x421   :  { %p827_p6 = pnand %p825_p5, %p822_p4 }
 0x423   :  { %830 = shalt.err (!%p827_p6)
}
 0x424   :  { %s867_s13 = smov 128   ;;  %s868_s14 = smov 8  }
 0x425   :  { %600 = dma.vmem_to_hbm [thread:$0]  %s595_s26, 256, %s1065_s10, [#allocation12], %s867_s13, %s867_s13, %s868_s14  }
 0x426   :  { %845 = dma.done.wait [#allocation12], 256  }
 0x427   :  { %846 = vsyncadd [#allocation12], 4294967040 }
 0x428   :  { %604 = vsyncpa [#allocation12], 1 }

</bundles_post_ra>
